<compile_context>
chip_gen: v7x
topology: tpu7x:2x2x1
jax: 0.10.0
libtpu: 0.0.40
codegen_flags: <defaults>
</compile_context>

<pallas_src>
import jax
import jax.numpy as jnp
from jax.experimental import pallas as pl
from jax.experimental.pallas import tpu as pltpu


def _make_cosine_kernel(n_rows: int, tile_n: int):
    """Kernel computing the per-tile sum of cosine similarities."""

    def kernel(x_ref, y_ref, o_ref):
        # Stream at the input dtype; widen per-tile in registers.
        x = x_ref[...].astype(jnp.float32)          # (TILE_N, D_pad)
        y = y_ref[...].astype(jnp.float32)

        eps2 = jnp.float32(1e-16)                   # (torch eps=1e-8)^2

        dot = jnp.sum(x * y, axis=-1, keepdims=True)   # (TILE_N, 1)
        nx2 = jnp.sum(x * x, axis=-1, keepdims=True)   # (TILE_N, 1)
        ny2 = jnp.sum(y * y, axis=-1, keepdims=True)   # (TILE_N, 1)

        # dot / (max(nx, eps) * max(ny, eps)) with a single rsqrt on the EUP.
        denom2 = jnp.maximum(nx2, eps2) * jnp.maximum(ny2, eps2)
        sim = dot * jax.lax.rsqrt(denom2)              # (TILE_N, 1)

        # Mask rows beyond N (last tile may be padded with garbage).
        row = (pl.program_id(0) * tile_n
               + jax.lax.broadcasted_iota(jnp.int32, (tile_n, 1), 0))
        sim = jnp.where(row < n_rows, sim, jnp.float32(0.0))

        partial = jnp.sum(sim, keepdims=True)          # (1, 1)
        # Lane-dense unmasked store of the tile's partial sum.
        o_ref[0] = jnp.broadcast_to(partial, (1, 128))

    return kernel


def _choose_tile_n(n: int, d_pad: int, itemsize: int,
                   budget_bytes: int = 16 * 1024 * 1024) -> int:
    """Largest row tile s.t. 2 inputs x 2 pipeline buffers fit the budget."""
    bytes_per_row = 2 * 2 * d_pad * itemsize      # 2 inputs, double-buffered
    tile = budget_bytes // max(bytes_per_row, 1)
    tile = max(8, min(int(tile), 4096))
    tile = (tile // 8) * 8                        # sublane multiple
    n_up = ((n + 7) // 8) * 8
    tile = max(8, min(tile, n_up))
    return tile


def cosine_loss(inputs: jax.Array, targets: jax.Array, tile_n=None) -> jax.Array:
    """Pallas TPU implementation of CosineLoss.forward(inputs, targets)."""
    assert inputs.shape == targets.shape and inputs.ndim == 2
    n, d = inputs.shape

    # Lane-dense feature axis: pad D up to a multiple of 128 with zeros
    # (zero padding does not change dot products or squared norms).
    d_pad = ((d + 127) // 128) * 128
    if d_pad != d:
        pad = ((0, 0), (0, d_pad - d))
        inputs = jnp.pad(inputs, pad)
        targets = jnp.pad(targets, pad)

    itemsize = jnp.dtype(inputs.dtype).itemsize
    if tile_n is None:
        tile_n = _choose_tile_n(n, d_pad, itemsize)
    assert tile_n % 8 == 0 and tile_n > 0
    num_tiles = pl.cdiv(n, tile_n)

    kernel = _make_cosine_kernel(n, tile_n)

    partials = pl.pallas_call(
        kernel,
        out_shape=jax.ShapeDtypeStruct((num_tiles, 1, 128), jnp.float32),
        grid_spec=pltpu.PrefetchScalarGridSpec(
            num_scalar_prefetch=0,
            grid=(num_tiles,),
            in_specs=[
                pl.BlockSpec((tile_n, d_pad), lambda i: (i, 0)),
                pl.BlockSpec((tile_n, d_pad), lambda i: (i, 0)),
            ],
            out_specs=pl.BlockSpec((1, 1, 128), lambda i: (i, 0, 0)),
        ),
        compiler_params=pltpu.CompilerParams(
            dimension_semantics=("parallel",),
            vmem_limit_bytes=32 * 1024 * 1024,
        ),
    )(inputs, targets)

    sim_sum = jnp.sum(partials[:, 0, 0])
    return jnp.float32(1.0) - sim_sum / jnp.float32(n)


def _reference(inputs, targets):
    eps = 1e-8
    dot = jnp.sum(inputs * targets, axis=1)
    nx = jnp.maximum(jnp.linalg.norm(inputs, axis=1), eps)
    ny = jnp.maximum(jnp.linalg.norm(targets, axis=1), eps)
    return 1.0 - jnp.sum(dot / (nx * ny)) / inputs.shape[0]


if __name__ == "__main__":
    key = jax.random.PRNGKey(0)
    k1, k2, k3, k4 = jax.random.split(key, 4)

    # Case 1: small batch of embeddings, cosine along D (dim=1).
    N, D = 8, 32
    inputs = jax.random.normal(k1, (N, D), dtype=jnp.float32)
    targets = jax.random.normal(k2, (N, D), dtype=jnp.float32)

    loss = cosine_loss(inputs, targets)
    jax.block_until_ready(loss)
    ref = _reference(inputs, targets)
    assert jnp.allclose(loss, ref, atol=1e-5, rtol=1e-5), (loss, ref)

    # Case 2: N not a multiple of the tile and D not a multiple of 128,
    # forcing multiple tiles + row masking + lane padding.
    N2, D2 = 20, 200
    inputs2 = jax.random.normal(k3, (N2, D2), dtype=jnp.float32)
    targets2 = jax.random.normal(k4, (N2, D2), dtype=jnp.float32)

    loss2 = cosine_loss(inputs2, targets2, tile_n=8)
    jax.block_until_ready(loss2)
    ref2 = _reference(inputs2, targets2)
    assert jnp.allclose(loss2, ref2, atol=1e-5, rtol=1e-5), (loss2, ref2)

    print("KERNEL_OK")
</pallas_src>

<mosaic_0001>
module attributes {stable_mosaic.version = 11 : i64} {
  func.func @kernel(%arg0: i32, %arg1: memref<8x128xf32, #tpu.memory_space<vmem>>, %arg2: memref<8x128xf32, #tpu.memory_space<vmem>>, %arg3: memref<1x1x128xf32, #tpu.memory_space<vmem>>) attributes {dimension_semantics = [#tpu.dimension_semantics<parallel>], iteration_bounds = array<i64: 1>, scalar_prefetch = 0 : i64, scratch_operands = 0 : i64, tpu.core_type = #tpu.core_type<tc>, window_params = [{transform_indices = @transform_0, window_bounds = array<i64: 8, 128>}, {transform_indices = @transform_1, window_bounds = array<i64: 8, 128>}, {transform_indices = @transform_2, window_bounds = array<i64: 1, 1, 128>}]} {
    %c0 = arith.constant 0 : index
    %c0_0 = arith.constant 0 : index
    %0 = vector.load %arg1[%c0, %c0_0] : memref<8x128xf32, #tpu.memory_space<vmem>>, vector<8x128xf32>
    %c0_1 = arith.constant 0 : index
    %c0_2 = arith.constant 0 : index
    %1 = vector.load %arg2[%c0_1, %c0_2] : memref<8x128xf32, #tpu.memory_space<vmem>>, vector<8x128xf32>
    %2 = arith.mulf %0, %1 : vector<8x128xf32>
    %cst = arith.constant dense<0.000000e+00> : vector<8xf32>
    %3 = vector.multi_reduction <add>, %2, %cst [1] : vector<8x128xf32> to vector<8xf32>
    %4 = vector.shape_cast %3 : vector<8xf32> to vector<8x1xf32>
    %5 = arith.mulf %0, %0 : vector<8x128xf32>
    %cst_3 = arith.constant dense<0.000000e+00> : vector<8xf32>
    %6 = vector.multi_reduction <add>, %5, %cst_3 [1] : vector<8x128xf32> to vector<8xf32>
    %7 = vector.shape_cast %6 : vector<8xf32> to vector<8x1xf32>
    %8 = arith.mulf %1, %1 : vector<8x128xf32>
    %cst_4 = arith.constant dense<0.000000e+00> : vector<8xf32>
    %9 = vector.multi_reduction <add>, %8, %cst_4 [1] : vector<8x128xf32> to vector<8xf32>
    %10 = vector.shape_cast %9 : vector<8xf32> to vector<8x1xf32>
    %cst_5 = arith.constant 1.000000e-16 : f32
    %11 = vector.broadcast %cst_5 : f32 to vector<8x1xf32>
    %12 = arith.maximumf %7, %11 : vector<8x1xf32>
    %cst_6 = arith.constant 1.000000e-16 : f32
    %13 = vector.broadcast %cst_6 : f32 to vector<8x1xf32>
    %14 = arith.maximumf %10, %13 : vector<8x1xf32>
    %15 = arith.mulf %12, %14 : vector<8x1xf32>
    %16 = math.rsqrt %15 : vector<8x1xf32>
    %17 = arith.mulf %4, %16 : vector<8x1xf32>
    %c8_i32 = arith.constant 8 : i32
    %18 = arith.muli %arg0, %c8_i32 : i32
    %19 = tpu.iota {dimensions = array<i32: 0>} : vector<8x1xi32>
    %20 = vector.broadcast %18 : i32 to vector<8x1xi32>
    %21 = arith.addi %20, %19 : vector<8x1xi32>
    %c8_i32_7 = arith.constant 8 : i32
    %22 = vector.broadcast %c8_i32_7 : i32 to vector<8x1xi32>
    %23 = arith.cmpi slt, %21, %22 : vector<8x1xi32>
    %cst_8 = arith.constant 0.000000e+00 : f32
    %24 = vector.broadcast %cst_8 : f32 to vector<8x1xf32>
    %25 = arith.select %23, %17, %24 : vector<8x1xi1>, vector<8x1xf32>
    %26 = vector.shape_cast %25 : vector<8x1xf32> to vector<1x8x1xf32>
    %cst_9 = arith.constant dense<0.000000e+00> : vector<1xf32>
    %27 = vector.multi_reduction <add>, %26, %cst_9 [1, 2] : vector<1x8x1xf32> to vector<1xf32>
    %28 = vector.shape_cast %27 : vector<1xf32> to vector<1x1x1xf32>
    %29 = vector.extract %28[0, 0, 0] : f32 from vector<1x1x1xf32>
    %30 = vector.broadcast %29 : f32 to vector<1x1xf32>
    %31 = vector.shape_cast %30 : vector<1x1xf32> to vector<1x1xf32>
    %32 = vector.broadcast %31 : vector<1x1xf32> to vector<1x128xf32>
    %c0_10 = arith.constant 0 : index
    %c0_11 = arith.constant 0 : index
    %c0_12 = arith.constant 0 : index
    %33 = vector.load %arg3[%c0_10, %c0_11, %c0_12] : memref<1x1x128xf32, #tpu.memory_space<vmem>>, vector<1x1x128xf32>
    %34 = vector.shape_cast %33 : vector<1x1x128xf32> to vector<1x128xf32>
    %35 = vector.shape_cast %32 : vector<1x128xf32> to vector<1x1x128xf32>
    tpu.vector_store %arg3[%c0_10, %c0_11, %c0_12], %35 {strides = array<i32>} : memref<1x1x128xf32, #tpu.memory_space<vmem>>, vector<1x1x128xf32>,
    return
  }
  func.func @transform_0(%arg0: i32) -> (i32, i32) {
    %c0_i32 = arith.constant 0 : i32
    %c0_i32_0 = arith.constant 0 : i32
    return %arg0, %c0_i32 : i32, i32
  }
  func.func @transform_1(%arg0: i32) -> (i32, i32) {
    %c0_i32 = arith.constant 0 : i32
    %c0_i32_0 = arith.constant 0 : i32
    return %arg0, %c0_i32 : i32, i32
  }
  func.func @transform_2(%arg0: i32) -> (i32, i32, i32) {
    %c0_i32 = arith.constant 0 : i32
    %c0_i32_0 = arith.constant 0 : i32
    %c0_i32_1 = arith.constant 0 : i32
    return %arg0, %c0_i32, %c0_i32_0 : i32, i32, i32
  }
}

</mosaic_0001>

<bundles_post_ra>
// kernel: tpu_custom_call.1
= control target key start
LH: loop header
LB: loop body
LE: loop exit
PB: predicated region body
PF: predicated region fallthrough
CT: control target
= control target key end

     0   :  { %7 = vsyncpa [#allocation3], 0  ;;  %s221_s0 = inlined_call_operand.hbm [shape: f32[8,128], index: 0, kind: input, shape index: {}]   ;;  %s222_s1 = inlined_call_operand.hbm [shape: f32[8,128], index: 1, kind: input, shape index: {}]   ;;  %s223_s2 = inlined_call_operand.hbm [shape: f32[1,1,128], index: 2, kind: output, shape index: {}]  }
   0x1   :  { %8 = vsyncpa [#allocation6], 0 }
   0x2   :  { %9 = vsyncpa [#allocation4], 0  ;;  %s167_s9 = smov [#allocation2]   ;;  %s168_s11 = smov [#allocation5]  }
   0x3   :  { %s16_s10 = sshll.u32 %s167_s9, 4  ;;  %s26_s12 = sshll.u32 %s168_s11, 4  ;;  %s17_s10 = int_to_ptr.vmem [resolvable:$true] %s16_s10  ;;  %s27_s12 = int_to_ptr.vmem [resolvable:$true] %s26_s12 }
   0x4   :  { %s95_s15 = scalar_lea.hbm %s221_s0, 128 }
   0x5   :  { %p96_p0 = scmp.ne.s32.totalorder %s221_s0, %s95_s15  ;;  %p99_p1 = scmp.lt.u32.totalorder %s95_s15, %s221_s0 }
   0x7   :  { %p101_p2 = pnand %p99_p1, %p96_p0 }
   0x9   :  { %104 = shalt.err (!%p101_p2)
}
   0xa   :  { %s105_s20 = scalar_lea.vmem %s17_s10, 128  ;;  %p110_p4 = scmp.lt.s32.totalorder %s17_s10, %s17_s10 }
   0xb   :  { %p106_p3 = scmp.ne.s32.totalorder %s17_s10, %s105_s20  ;;  %p111_p5 = scmp.lt.s32.totalorder %s105_s20, %s105_s20 }
   0xd   :  { %p112_p6 = por %p111_p5, %p110_p4 }
   0xf   :  { %p113_p7 = pnand %p112_p6, %p106_p3 }
  0x11   :  { %116 = shalt.err (!%p113_p7)
}
  0x12   :  { %19 = dma.hbm_to_vmem [thread:$0]  %s221_s0, 128, %s17_s10, [#allocation3]  }
  0x13   :  { %s117_s25 = scalar_lea.hbm %s222_s1, 128 }
  0x14   :  { %p118_p8 = scmp.ne.s32.totalorder %s222_s1, %s117_s25  ;;  %p121_p9 = scmp.lt.u32.totalorder %s117_s25, %s222_s1 }
  0x16   :  { %p123_p10 = pnand %p121_p9, %p118_p8 }
  0x18   :  { %126 = shalt.err (!%p123_p10)
}
  0x19   :  { %s127_s30 = scalar_lea.vmem %s27_s12, 128  ;;  %p132_p12 = scmp.lt.s32.totalorder %s27_s12, %s27_s12 }
  0x1a   :  { %p128_p11 = scmp.ne.s32.totalorder %s27_s12, %s127_s30  ;;  %p133_p13 = scmp.lt.s32.totalorder %s127_s30, %s127_s30 }
  0x1c   :  { %p134_p0 = por %p133_p13, %p132_p12 }
  0x1e   :  { %p135_p1 = pnand %p134_p0, %p128_p11 }
  0x20   :  { %138 = shalt.err (!%p135_p1)
}
  0x21   :  { %29 = dma.hbm_to_vmem [thread:$0]  %s222_s1, 128, %s27_s12, [#allocation6]  }
  0x22   :  { %161 = dma.done.wait [#allocation3], 128  }
  0x23   :  { %162 = vsyncadd [#allocation3], 4294967168 }
  0x24   :  { %163 = dma.done.wait [#allocation6], 128  }
  0x25   :  { %164 = vsyncadd [#allocation6], 4294967168  ;;  %v36_v0 = vld [vmem:[#allocation2] sm:$0xff]  ;;  %v37_v1 = vld [vmem:[#allocation5] sm:$0xff]  ;;  %vm59_vm0 = vcmask 7168   ;;  %s169_s1 = smov [#allocation7]  }
  0x26   :  { %v41_v2 = vmul.f32 %v36_v0, %v36_v0  ;;  %v38_v3 = vmul.f32 %v37_v1, %v36_v0  ;;  %v44_v4 = vmul.f32 %v37_v1, %v37_v1  ;;  %s78_s4 = sshll.u32 %s169_s1, 4  ;;  %s79_s4 = int_to_ptr.vmem [resolvable:$true] %s78_s4 }
  0x27   :  { %s139_s6 = scalar_lea.vmem %s79_s4, 16  ;;  %s143_s7 = scalar_lea.vmem %s79_s4, 32 }
  0x28   :  { %42 = vadd.xlane.f32.xlu0 %v41_v2  ;;  %39 = vadd.xlane.f32.xlu1 %v38_v3  ;;  %p140_p2 = scmp.ne.s32.totalorder %s79_s4, %s139_s6  ;;  %p144_p3 = scmp.lt.s32.totalorder %s79_s4, %s79_s4 }
  0x29   :  { %p145_p4 = scmp.lt.s32.totalorder %s143_s7, %s139_s6 }
  0x2b   :  { %p146_p5 = por %p145_p4, %p144_p3 }
  0x2c   :  { %45 = vadd.xlane.f32.xlu0 %v44_v4 }
  0x2d   :  { %p147_p6 = pnand %p146_p5, %p140_p2 }
  0xb5   :  { %v43_v5 = vpop.xlane.xlu0 %42  ;;  %v40_v10 = vpop.xlane.xlu1 %39 }
  0xb6   :  { %v47_v7 = vmax.f32 %v43_v5, 1e-16 }
  0xb9   :  { %v46_v6 = vpop.xlane.xlu0 %45 }
  0xba   :  { %v48_v8 = vmax.f32 %v46_v6, 1e-16 }
  0xbc   :  { %v49_v9 = vmul.f32 %v48_v8, %v47_v7 }
  0xbe   :  { %93 = vrsqrt.f32 %v49_v9 }
  0xc8   :  { %v94_v11 = vpop.eup %93 }
  0xc9   :  { %v51_v12 = vmul.f32 %v94_v11, %v40_v10 }
  0xcb   :  { %v60_v13 = vsel %vm59_vm0, %v51_v12, 0.0 }
  0xcc   :  { %61 = vadd.xlane.f32.xlu1 %v60_v13 }
 0x159   :  { %v62_v14 = vpop.xlane.xlu1 %61 }
 0x15a   :  { %v63_v15 = vrot.slane %v62_v14, 4 }
 0x15c   :  { %v64_v16 = vadd.f32 %v63_v15, %v62_v14 }
 0x15e   :  { %v65_v17 = vrot.slane %v64_v16, 2 }
 0x160   :  { %v66_v18 = vadd.f32 %v65_v17, %v64_v16 }
 0x162   :  { %v67_v19 = vrot.slane %v66_v18, 1 }
 0x164   :  { %v68_v20 = vadd.f32 %v67_v19, %v66_v18 }
 0x166   :  { %88 = vpush %v68_v20 }
 0x197   :  { %s89_s5 = spop %88 }
 0x198   :  { %v70_v21 = vstv %s89_s5 }
 0x199   :  { %71 = vst [vmem:[#allocation7] sm:$0x1] %v70_v21 }
 0x19a   :  { %150 = shalt.err (!%p147_p6)
}
 0x19b   :  { %s151_s10 = scalar_lea.hbm %s223_s2, 16 }
 0x19c   :  { %p152_p7 = scmp.ne.s32.totalorder %s223_s2, %s151_s10  ;;  %p155_p8 = scmp.lt.u32.totalorder %s151_s10, %s223_s2 }
 0x19e   :  { %p157_p9 = pnand %p155_p8, %p152_p7 }
 0x1a0   :  { %160 = shalt.err (!%p157_p9)
}
 0x1a1   :  { %81 = dma.vmem_to_hbm [thread:$0]  %s79_s4, 16, %s223_s2, [#allocation4]  }
 0x1a2   :  { %165 = dma.done.wait [#allocation4], 16  }
 0x1a3   :  { %166 = vsyncadd [#allocation4], 4294967280 }
 0x1a4   :  { %85 = vsyncpa [#allocation3], 1 }
 0x1a5   :  { %86 = vsyncpa [#allocation6], 1 }
 0x1a6   :  { %87 = vsyncpa [#allocation4], 1 }

</bundles_post_ra>
